<compile_context>
chip_gen: v5e
topology: v5e:2x2
jax: 0.10.0
libtpu: 0.0.40
codegen_flags: <defaults>
</compile_context>

<pallas_src>
import functools
import math

import jax
import jax.numpy as jnp
from jax.experimental import pallas as pl
from jax.experimental.pallas import tpu as pltpu

_BN_EPS = 1e-5


# ---------------------------------------------------------------------------
# Kernel: whole MLP (BN-folded) for one batch tile.
# ---------------------------------------------------------------------------
def _dnn_kernel(x_ref,
                w0_ref, w1_ref, w1b_ref, w2_ref, w3_ref, w5_ref,
                bias_ref,                       # (8, 128) packed biases, f32
                o_ref,                          # (TILE_B, 128) lane-dense out
                *, use_softmax: bool, bf16: bool, n_targets: int):
    x = x_ref[...].astype(jnp.float32)
    biases = bias_ref[...]                      # read the packed biases once

    def dense(h, w_ref, row, relu):
        n_out = w_ref.shape[-1]
        lhs = h.astype(jnp.bfloat16) if bf16 else h
        y = jnp.dot(lhs, w_ref[...], preferred_element_type=jnp.float32)
        y = y + biases[row:row + 1, :n_out]
        return jnp.maximum(y, 0.0) if relu else y

    x = dense(x, w0_ref, 0, True)        # BN0 folded + Linear(n_in, 50) + ReLU
    x = dense(x, w1_ref, 1, True)        # Linear(50, 40) + ReLU
    x = dense(x, w1b_ref, 2, True)       # Linear(40, 40) + ReLU
    x = dense(x, w2_ref, 3, True)        # Linear(40, 10) + ReLU
    x = dense(x, w3_ref, 4, True)        # BN3 folded + Linear(10, 5) + ReLU
    logits = dense(x, w5_ref, 5, False)  # BN5 folded + Linear(5, 128-padded)

    if use_softmax:
        # Softmax only over the first n_targets lanes; padded lanes -> 0.
        lane = jax.lax.broadcasted_iota(jnp.int32, logits.shape, 1)
        logits = jnp.where(lane < n_targets, logits, jnp.float32(-1e30))
        m = jnp.max(logits, axis=-1, keepdims=True)
        e = jnp.exp(logits - m)
        denom = jnp.sum(e, axis=-1, keepdims=True)
        o_ref[...] = e * pl.reciprocal(denom, approx=True)
    else:
        o_ref[...] = pl.reciprocal(1.0 + jnp.exp(-logits), approx=True)


# ---------------------------------------------------------------------------
# Parameter construction (mirrors the PyTorch module) and folding.
# ---------------------------------------------------------------------------
def make_params(key, n_inputs, n_targets):
    """Raw parameters matching the PyTorch DNN (Linear + BatchNorm1d)."""
    lin_dims = {'f0': (n_inputs, 50), 'f1': (50, 40), 'f1b': (40, 40),
                'f2': (40, 10), 'f3': (10, 5), 'f5': (5, n_targets)}
    bn_dims = {'b0': n_inputs, 'b3': 10, 'b5': 5}   # b2 exists but is unused in forward
    params = {}
    keys = iter(jax.random.split(key, 2 * len(lin_dims) + 4 * len(bn_dims)))
    for name, (fan_in, fan_out) in lin_dims.items():
        bound = 1.0 / math.sqrt(fan_in)
        w = jax.random.uniform(next(keys), (fan_in, fan_out), jnp.float32, -bound, bound)
        b = jax.random.uniform(next(keys), (fan_out,), jnp.float32, -bound, bound)
        params[name] = (w, b)
    for name, feat in bn_dims.items():
        gamma = 1.0 + 0.1 * jax.random.normal(next(keys), (feat,), jnp.float32)
        beta = 0.1 * jax.random.normal(next(keys), (feat,), jnp.float32)
        mean = 0.1 * jax.random.normal(next(keys), (feat,), jnp.float32)
        var = jnp.abs(1.0 + 0.1 * jax.random.normal(next(keys), (feat,), jnp.float32))
        params[name] = (gamma, beta, mean, var)
    return params


def _fold_bn_into_linear(bn, lin):
    """BN(x) @ w + b  ==  x @ (diag(s) @ w) + (h @ w + b)  with s,h from running stats."""
    gamma, beta, mean, var = bn
    w, b = lin
    s = gamma / jnp.sqrt(var + _BN_EPS)
    h = beta - mean * s
    return s[:, None] * w, b + h @ w


def _prepare_kernel_params(params, n_targets, bf16):
    w0, b0 = _fold_bn_into_linear(params['b0'], params['f0'])
    w1, b1 = params['f1']
    w1b, b1b = params['f1b']
    w2, b2 = params['f2']
    w3, b3 = _fold_bn_into_linear(params['b3'], params['f3'])
    w5, b5 = _fold_bn_into_linear(params['b5'], params['f5'])

    # Lane-dense final layer: zero-pad output columns to 128 so the kernel's
    # final store is a full, unmasked vector store.
    w5 = jnp.pad(w5, ((0, 0), (0, 128 - n_targets)))
    b5 = jnp.pad(b5, (0, 128 - n_targets))

    weights = [w0, w1, w1b, w2, w3, w5]
    if bf16:
        weights = [w.astype(jnp.bfloat16) for w in weights]

    bias_pack = jnp.zeros((8, 128), jnp.float32)
    for i, b in enumerate([b0, b1, b1b, b2, b3, b5]):
        bias_pack = bias_pack.at[i, :b.shape[0]].set(b.astype(jnp.float32))
    return weights, bias_pack


# ---------------------------------------------------------------------------
# Wrapper
# ---------------------------------------------------------------------------
def dnn_forward(x, params, n_targets, *, tile_b=None, bf16_matmul=False):
    if n_targets in (1, 2):
        use_softmax = False
    elif n_targets > 2:
        use_softmax = True
    else:
        raise ValueError("I don't understand n_targets " + str(n_targets))
    assert n_targets <= 128

    B = x.shape[0]
    xf = x.reshape(B, -1).astype(jnp.float32)       # torch.flatten(x, start_dim=1)
    n_in = xf.shape[1]

    weights, bias_pack = _prepare_kernel_params(params, n_targets, bf16_matmul)

    # Batch tile: multiple of 8 sublanes; modest cap keeps double-buffered
    # activation tiles far below even v7x's 64 MiB VMEM.
    if tile_b is None:
        tile_b = max(8, min(256, pl.next_power_of_2(B)))
    tile_b = ((tile_b + 7) // 8) * 8
    b_pad = pl.cdiv(B, tile_b) * tile_b
    if b_pad != B:
        xf = jnp.pad(xf, ((0, b_pad - B), (0, 0)))

    grid = (b_pad // tile_b,)

    def const_spec(shape):
        # Weights / biases: same block every grid step -> stay VMEM-resident.
        return pl.BlockSpec(shape, lambda i: (0, 0))

    kernel = functools.partial(_dnn_kernel, use_softmax=use_softmax,
                               bf16=bf16_matmul, n_targets=n_targets)

    out_padded = pl.pallas_call(
        kernel,
        out_shape=jax.ShapeDtypeStruct((b_pad, 128), jnp.float32),
        grid=grid,
        in_specs=[pl.BlockSpec((tile_b, n_in), lambda i: (i, 0))]
                 + [const_spec(w.shape) for w in weights]
                 + [const_spec(bias_pack.shape)],
        out_specs=pl.BlockSpec((tile_b, 128), lambda i: (i, 0)),
        compiler_params=pltpu.CompilerParams(
            dimension_semantics=("parallel",)),
    )(xf, *weights, bias_pack)

    return out_padded[:B, :n_targets]


# ---------------------------------------------------------------------------
# Pure-JAX reference (uses the UNfolded BN params -> validates the folding too).
# ---------------------------------------------------------------------------
def dnn_reference(x, params, n_targets):
    B = x.shape[0]
    h = x.reshape(B, -1).astype(jnp.float32)

    def bn(h, p):
        gamma, beta, mean, var = p
        return (h - mean) / jnp.sqrt(var + _BN_EPS) * gamma + beta

    def lin(h, p):
        w, b = p
        return h @ w + b

    h = bn(h, params['b0'])
    h = jax.nn.relu(lin(h, params['f0']))
    h = jax.nn.relu(lin(h, params['f1']))
    h = jax.nn.relu(lin(h, params['f1b']))
    h = jax.nn.relu(lin(h, params['f2']))
    h = bn(h, params['b3'])
    h = jax.nn.relu(lin(h, params['f3']))
    h = bn(h, params['b5'])
    logits = lin(h, params['f5'])
    if n_targets > 2:
        return jax.nn.softmax(logits, axis=1)
    return jax.nn.sigmoid(logits)


if __name__ == "__main__":
    key = jax.random.PRNGKey(0)
    k_x, k_p, k_p1 = jax.random.split(key, 3)

    # batch=8, input (8, 4, 8) -> flattened n_inputs=32, n_targets=3 (softmax path)
    batch, n_inputs, n_targets = 8, 32, 3
    x = jax.random.normal(k_x, (batch, 4, 8), dtype=jnp.float32)

    # --- softmax path, f32 matmul operands ---
    params = make_params(k_p, n_inputs, n_targets)
    ref = dnn_reference(x, params, n_targets)
    out = jax.block_until_ready(dnn_forward(x, params, n_targets))
    assert out.shape == (batch, n_targets)
    assert jnp.allclose(out, ref, atol=1e-3, rtol=1e-3), "f32 softmax path mismatch"

    # --- same path, bf16 matmul operands (f32 accumulation) ---
    out_bf16 = jax.block_until_ready(
        dnn_forward(x, params, n_targets, bf16_matmul=True))
    assert jnp.allclose(out_bf16, ref, atol=3e-2, rtol=3e-2), "bf16 softmax path mismatch"

    # --- sigmoid path (n_targets=1) ---
    params1 = make_params(k_p1, n_inputs, 1)
    ref1 = dnn_reference(x, params1, 1)
    out1 = jax.block_until_ready(dnn_forward(x, params1, 1))
    assert out1.shape == (batch, 1)
    assert jnp.allclose(out1, ref1, atol=1e-3, rtol=1e-3), "f32 sigmoid path mismatch"

    print("KERNEL_OK")
</pallas_src>

<mosaic_0001>
module attributes {stable_mosaic.version = 11 : i64} {
  func.func @_dnn_kernel(%arg0: i32, %arg1: memref<8x32xf32, #tpu.memory_space<vmem>>, %arg2: memref<32x50xf32, #tpu.memory_space<vmem>>, %arg3: memref<50x40xf32, #tpu.memory_space<vmem>>, %arg4: memref<40x40xf32, #tpu.memory_space<vmem>>, %arg5: memref<40x10xf32, #tpu.memory_space<vmem>>, %arg6: memref<10x5xf32, #tpu.memory_space<vmem>>, %arg7: memref<5x128xf32, #tpu.memory_space<vmem>>, %arg8: memref<8x128xf32, #tpu.memory_space<vmem>>, %arg9: memref<8x128xf32, #tpu.memory_space<vmem>>) attributes {dimension_semantics = [#tpu.dimension_semantics<parallel>], iteration_bounds = array<i64: 1>, scalar_prefetch = 0 : i64, scratch_operands = 0 : i64, tpu.core_type = #tpu.core_type<tc>, window_params = [{transform_indices = @transform_0, window_bounds = array<i64: 8, 32>}, {pipeline_mode = #tpu.pipeline_mode<synchronous>, transform_indices = @transform_1, window_bounds = array<i64: 32, 50>}, {pipeline_mode = #tpu.pipeline_mode<synchronous>, transform_indices = @transform_2, window_bounds = array<i64: 50, 40>}, {pipeline_mode = #tpu.pipeline_mode<synchronous>, transform_indices = @transform_3, window_bounds = array<i64: 40, 40>}, {pipeline_mode = #tpu.pipeline_mode<synchronous>, transform_indices = @transform_4, window_bounds = array<i64: 40, 10>}, {pipeline_mode = #tpu.pipeline_mode<synchronous>, transform_indices = @transform_5, window_bounds = array<i64: 10, 5>}, {pipeline_mode = #tpu.pipeline_mode<synchronous>, transform_indices = @transform_6, window_bounds = array<i64: 5, 128>}, {pipeline_mode = #tpu.pipeline_mode<synchronous>, transform_indices = @transform_7, window_bounds = array<i64: 8, 128>}, {transform_indices = @transform_8, window_bounds = array<i64: 8, 128>}]} {
    %c0 = arith.constant 0 : index
    %c0_0 = arith.constant 0 : index
    %0 = vector.load %arg1[%c0, %c0_0] : memref<8x32xf32, #tpu.memory_space<vmem>>, vector<8x32xf32>
    %c0_1 = arith.constant 0 : index
    %c0_2 = arith.constant 0 : index
    %1 = vector.load %arg8[%c0_1, %c0_2] : memref<8x128xf32, #tpu.memory_space<vmem>>, vector<8x128xf32>
    %c0_3 = arith.constant 0 : index
    %c0_4 = arith.constant 0 : index
    %2 = vector.load %arg2[%c0_3, %c0_4] : memref<32x50xf32, #tpu.memory_space<vmem>>, vector<32x50xf32>
    %cst = arith.constant dense<0.000000e+00> : vector<8x50xf32>
    %3 = tpu.matmul %0, %2, %cst {dimension_numbers = #tpu.dot_dimension_numbers<[1], [0], [0], [1], [0, 0, 1, 1], [], []>} : vector<8x32xf32>, vector<32x50xf32>, vector<8x50xf32> -> vector<8x50xf32>
    %4 = vector.extract_strided_slice %1 {offsets = [0, 0], sizes = [1, 50], strides = [1, 1]} : vector<8x128xf32> to vector<1x50xf32>
    %5 = vector.broadcast %4 : vector<1x50xf32> to vector<8x50xf32>
    %6 = arith.addf %3, %5 : vector<8x50xf32>
    %cst_5 = arith.constant 0.000000e+00 : f32
    %7 = vector.broadcast %cst_5 : f32 to vector<8x50xf32>
    %8 = arith.maximumf %6, %7 : vector<8x50xf32>
    %c0_6 = arith.constant 0 : index
    %c0_7 = arith.constant 0 : index
    %9 = vector.load %arg3[%c0_6, %c0_7] : memref<50x40xf32, #tpu.memory_space<vmem>>, vector<50x40xf32>
    %cst_8 = arith.constant dense<0.000000e+00> : vector<8x40xf32>
    %10 = tpu.matmul %8, %9, %cst_8 {dimension_numbers = #tpu.dot_dimension_numbers<[1], [0], [0], [1], [0, 0, 1, 1], [], []>} : vector<8x50xf32>, vector<50x40xf32>, vector<8x40xf32> -> vector<8x40xf32>
    %11 = vector.extract_strided_slice %1 {offsets = [1, 0], sizes = [1, 40], strides = [1, 1]} : vector<8x128xf32> to vector<1x40xf32>
    %12 = vector.broadcast %11 : vector<1x40xf32> to vector<8x40xf32>
    %13 = arith.addf %10, %12 : vector<8x40xf32>
    %cst_9 = arith.constant 0.000000e+00 : f32
    %14 = vector.broadcast %cst_9 : f32 to vector<8x40xf32>
    %15 = arith.maximumf %13, %14 : vector<8x40xf32>
    %c0_10 = arith.constant 0 : index
    %c0_11 = arith.constant 0 : index
    %16 = vector.load %arg4[%c0_10, %c0_11] : memref<40x40xf32, #tpu.memory_space<vmem>>, vector<40x40xf32>
    %cst_12 = arith.constant dense<0.000000e+00> : vector<8x40xf32>
    %17 = tpu.matmul %15, %16, %cst_12 {dimension_numbers = #tpu.dot_dimension_numbers<[1], [0], [0], [1], [0, 0, 1, 1], [], []>} : vector<8x40xf32>, vector<40x40xf32>, vector<8x40xf32> -> vector<8x40xf32>
    %18 = vector.extract_strided_slice %1 {offsets = [2, 0], sizes = [1, 40], strides = [1, 1]} : vector<8x128xf32> to vector<1x40xf32>
    %19 = vector.broadcast %18 : vector<1x40xf32> to vector<8x40xf32>
    %20 = arith.addf %17, %19 : vector<8x40xf32>
    %cst_13 = arith.constant 0.000000e+00 : f32
    %21 = vector.broadcast %cst_13 : f32 to vector<8x40xf32>
    %22 = arith.maximumf %20, %21 : vector<8x40xf32>
    %c0_14 = arith.constant 0 : index
    %c0_15 = arith.constant 0 : index
    %23 = vector.load %arg5[%c0_14, %c0_15] : memref<40x10xf32, #tpu.memory_space<vmem>>, vector<40x10xf32>
    %cst_16 = arith.constant dense<0.000000e+00> : vector<8x10xf32>
    %24 = tpu.matmul %22, %23, %cst_16 {dimension_numbers = #tpu.dot_dimension_numbers<[1], [0], [0], [1], [0, 0, 1, 1], [], []>} : vector<8x40xf32>, vector<40x10xf32>, vector<8x10xf32> -> vector<8x10xf32>
    %25 = vector.extract_strided_slice %1 {offsets = [3, 0], sizes = [1, 10], strides = [1, 1]} : vector<8x128xf32> to vector<1x10xf32>
    %26 = vector.broadcast %25 : vector<1x10xf32> to vector<8x10xf32>
    %27 = arith.addf %24, %26 : vector<8x10xf32>
    %cst_17 = arith.constant 0.000000e+00 : f32
    %28 = vector.broadcast %cst_17 : f32 to vector<8x10xf32>
    %29 = arith.maximumf %27, %28 : vector<8x10xf32>
    %c0_18 = arith.constant 0 : index
    %c0_19 = arith.constant 0 : index
    %30 = vector.load %arg6[%c0_18, %c0_19] : memref<10x5xf32, #tpu.memory_space<vmem>>, vector<10x5xf32>
    %cst_20 = arith.constant dense<0.000000e+00> : vector<8x5xf32>
    %31 = tpu.matmul %29, %30, %cst_20 {dimension_numbers = #tpu.dot_dimension_numbers<[1], [0], [0], [1], [0, 0, 1, 1], [], []>} : vector<8x10xf32>, vector<10x5xf32>, vector<8x5xf32> -> vector<8x5xf32>
    %32 = vector.extract_strided_slice %1 {offsets = [4, 0], sizes = [1, 5], strides = [1, 1]} : vector<8x128xf32> to vector<1x5xf32>
    %33 = vector.broadcast %32 : vector<1x5xf32> to vector<8x5xf32>
    %34 = arith.addf %31, %33 : vector<8x5xf32>
    %cst_21 = arith.constant 0.000000e+00 : f32
    %35 = vector.broadcast %cst_21 : f32 to vector<8x5xf32>
    %36 = arith.maximumf %34, %35 : vector<8x5xf32>
    %c0_22 = arith.constant 0 : index
    %c0_23 = arith.constant 0 : index
    %37 = vector.load %arg7[%c0_22, %c0_23] : memref<5x128xf32, #tpu.memory_space<vmem>>, vector<5x128xf32>
    %cst_24 = arith.constant dense<0.000000e+00> : vector<8x128xf32>
    %38 = tpu.matmul %36, %37, %cst_24 {dimension_numbers = #tpu.dot_dimension_numbers<[1], [0], [0], [1], [0, 0, 1, 1], [], []>} : vector<8x5xf32>, vector<5x128xf32>, vector<8x128xf32> -> vector<8x128xf32>
    %39 = vector.extract_strided_slice %1 {offsets = [5, 0], sizes = [1, 128], strides = [1, 1]} : vector<8x128xf32> to vector<1x128xf32>
    %40 = vector.broadcast %39 : vector<1x128xf32> to vector<8x128xf32>
    %41 = arith.addf %38, %40 : vector<8x128xf32>
    %42 = tpu.iota {dimensions = array<i32: 1>} : vector<8x128xi32>
    %c3_i32 = arith.constant 3 : i32
    %43 = vector.broadcast %c3_i32 : i32 to vector<8x128xi32>
    %44 = arith.cmpi slt, %42, %43 : vector<8x128xi32>
    %cst_25 = arith.constant -1.000000e+30 : f32
    %45 = vector.broadcast %cst_25 : f32 to vector<8x128xf32>
    %46 = arith.select %44, %41, %45 : vector<8x128xi1>, vector<8x128xf32>
    %cst_26 = arith.constant dense<0xFF800000> : vector<8xf32>
    %47 = vector.multi_reduction <maximumf>, %46, %cst_26 [1] : vector<8x128xf32> to vector<8xf32>
    %48 = vector.shape_cast %47 : vector<8xf32> to vector<8x1xf32>
    %49 = vector.broadcast %48 : vector<8x1xf32> to vector<8x128xf32>
    %50 = arith.subf %46, %49 : vector<8x128xf32>
    %51 = math.exp %50 : vector<8x128xf32>
    %cst_27 = arith.constant dense<0.000000e+00> : vector<8xf32>
    %52 = vector.multi_reduction <add>, %51, %cst_27 [1] : vector<8x128xf32> to vector<8xf32>
    %53 = vector.shape_cast %52 : vector<8xf32> to vector<8x1xf32>
    %54 = tpu.reciprocal %53 {approx = true} : vector<8x1xf32> -> vector<8x1xf32>
    %55 = vector.broadcast %54 : vector<8x1xf32> to vector<8x128xf32>
    %56 = arith.mulf %51, %55 : vector<8x128xf32>
    %c0_28 = arith.constant 0 : index
    %c0_29 = arith.constant 0 : index
    %57 = vector.load %arg9[%c0_28, %c0_29] : memref<8x128xf32, #tpu.memory_space<vmem>>, vector<8x128xf32>
    tpu.vector_store %arg9[%c0_28, %c0_29], %56 {strides = array<i32>} : memref<8x128xf32, #tpu.memory_space<vmem>>, vector<8x128xf32>,
    return
  }
  func.func @transform_0(%arg0: i32) -> (i32, i32) {
    %c0_i32 = arith.constant 0 : i32
    %c0_i32_0 = arith.constant 0 : i32
    return %arg0, %c0_i32 : i32, i32
  }
  func.func @transform_1(%arg0: i32) -> (i32, i32) {
    %c0_i32 = arith.constant 0 : i32
    %c0_i32_0 = arith.constant 0 : i32
    %c0_i32_1 = arith.constant 0 : i32
    return %c0_i32, %c0_i32_0 : i32, i32
  }
  func.func @transform_2(%arg0: i32) -> (i32, i32) {
    %c0_i32 = arith.constant 0 : i32
    %c0_i32_0 = arith.constant 0 : i32
    %c0_i32_1 = arith.constant 0 : i32
    return %c0_i32, %c0_i32_0 : i32, i32
  }
  func.func @transform_3(%arg0: i32) -> (i32, i32) {
    %c0_i32 = arith.constant 0 : i32
    %c0_i32_0 = arith.constant 0 : i32
    %c0_i32_1 = arith.constant 0 : i32
    return %c0_i32, %c0_i32_0 : i32, i32
  }
  func.func @transform_4(%arg0: i32) -> (i32, i32) {
    %c0_i32 = arith.constant 0 : i32
    %c0_i32_0 = arith.constant 0 : i32
    %c0_i32_1 = arith.constant 0 : i32
    return %c0_i32, %c0_i32_0 : i32, i32
  }
  func.func @transform_5(%arg0: i32) -> (i32, i32) {
    %c0_i32 = arith.constant 0 : i32
    %c0_i32_0 = arith.constant 0 : i32
    %c0_i32_1 = arith.constant 0 : i32
    return %c0_i32, %c0_i32_0 : i32, i32
  }
  func.func @transform_6(%arg0: i32) -> (i32, i32) {
    %c0_i32 = arith.constant 0 : i32
    %c0_i32_0 = arith.constant 0 : i32
    %c0_i32_1 = arith.constant 0 : i32
    return %c0_i32, %c0_i32_0 : i32, i32
  }
  func.func @transform_7(%arg0: i32) -> (i32, i32) {
    %c0_i32 = arith.constant 0 : i32
    %c0_i32_0 = arith.constant 0 : i32
    %c0_i32_1 = arith.constant 0 : i32
    return %c0_i32, %c0_i32_0 : i32, i32
  }
  func.func @transform_8(%arg0: i32) -> (i32, i32) {
    %c0_i32 = arith.constant 0 : i32
    %c0_i32_0 = arith.constant 0 : i32
    return %arg0, %c0_i32 : i32, i32
  }
}

</mosaic_0001>

<bundles_post_ra>
// kernel: tpu_custom_call.1
= control target key start
LH: loop header
LB: loop body
LE: loop exit
PB: predicated region body
PF: predicated region fallthrough
CT: control target
= control target key end

     0   :  { %vm74_vm0 = vcmask 1041408   ;;  %s420_s0 = inlined_call_operand.vmem [shape: f32[8,32], index: 0, kind: input, shape index: {}]   ;;  %s421_s1 = inlined_call_operand.vmem [shape: f32[32,50], index: 1, kind: input, shape index: {}]   ;;  %s422_s2 = inlined_call_operand.vmem [shape: f32[50,40], index: 2, kind: input, shape index: {}]   ;;  %s423_s3 = inlined_call_operand.vmem [shape: f32[40,40], index: 3, kind: input, shape index: {}]   ;;  %s424_s4 = inlined_call_operand.vmem [shape: f32[40,10], index: 4, kind: input, shape index: {}]   ;;  %s425_s5 = inlined_call_operand.vmem [shape: f32[10,5], index: 5, kind: input, shape index: {}]   ;;  %s426_s6 = inlined_call_operand.vmem [shape: f32[5,128], index: 6, kind: input, shape index: {}]   ;;  %s427_s7 = inlined_call_operand.vmem [shape: f32[8,128], index: 7, kind: input, shape index: {}]   ;;  %s428_s8 = inlined_call_operand.hbm [shape: f32[8,128], index: 8, kind: output, shape index: {}]  }
   0x1   :  { %v35_v0 = vld [vmem:[%s421_s1 + $0x18] sm:$0xff]  ;;  %v34_v1 = vld [vmem:[%s421_s1 + $0x10] sm:$0xff]  ;;  %v33_v3 = vld [vmem:[%s421_s1 + $0x8] sm:$0xff] }
   0x2   :  { %53 = vmatpush.msra.mxu0 %v35_v0  ;;  %v68_v2 = vld [vmem:[%s422_s2 + $0x30] sm:$0x3]  ;;  %v67_v4 = vld [vmem:[%s422_s2 + $0x28] sm:$0xff]  ;;  %v66_v5 = vld [vmem:[%s422_s2 + $0x20] sm:$0xff] }
   0x3   :  { %252 = vmatpush.msk.msra.mxu1 %vm74_vm0, %v68_v2 }
   0x4   :  { %54 = vmatpush.msra.mxu0 %v34_v1 }
   0x5   :  { %13 = vsyncpa [#allocation3], 0  ;;  %v32_v6 = vld [vmem:[%s421_s1] sm:$0xff]  ;;  %88 = vmatpush.msra.mxu1 %v67_v4  ;;  %vm37_vm1 = vcmask 261120   ;;  %v65_v8 = vld [vmem:[%s422_s2 + $0x18] sm:$0xff]  ;;  %vm70_vm2 = vcmask 408576   ;;  %v221_v46 = vlaneseq }
   0x6   :  { %55 = vmatpush.msra.mxu0 %v33_v3  ;;  %v30_v7 = vld [vmem:[%s420_s0] sm:$0xff]  ;;  %v64_v9 = vld [vmem:[%s422_s2 + $0x10] sm:$0xff]  ;;  %v63_v10 = vld [vmem:[%s422_s2 + $0x8] sm:$0xff]  ;;  %vm105_vm3 = vcmask 326656   ;;  %vm197_vm4 = vcmask 1044480   ;;  %vm163_vm5 = vcmask 80896  }
   0x7   :  { %89 = vmatpush.msra.mxu1 %v66_v5  ;;  %v62_v11 = vld [vmem:[%s422_s2] sm:$0xff]  ;;  %v102_v13 = vld [vmem:[%s423_s3 + $0x18] sm:$0xff]  ;;  %v101_v19 = vld [vmem:[%s423_s3 + $0x10] sm:$0xff]  ;;  %vm193_vm6 = vcmask 39936   ;;  %v222_v47 = vand.u32 127, %v221_v46  ;;  %s242_s29 = sshll.u32 %s428_s8, 4  ;;  %s243_s29 = int_to_ptr.hbm [resolvable:$true] %s242_s29 }
   0x8   :  { %56 = vmatpush.msra.mxu0 %v32_v6  ;;  %v103_v12 = vld [vmem:[%s423_s3 + $0x20] sm:$0xff]  ;;  %v100_v20 = vld [vmem:[%s423_s3 + $0x8] sm:$0xff]  ;;  %v133_v23 = vld [vmem:[%s424_s4 + $0x18] sm:$0xff] }
   0x9   :  { %251 = vmatmul.msk.f32.vlgmr.msra.gmra.mxu0 %vm37_vm1, %v30_v7  ;;  %90 = vmatpush.msra.mxu1 %v65_v8  ;;  %v31_v14 = vld [vmem:[%s427_s7] sm:$0xff]  ;;  %v132_v28 = vld [vmem:[%s424_s4 + $0x10] sm:$0xff]  ;;  %v131_v29 = vld [vmem:[%s424_s4 + $0x8] sm:$0xff]  ;;  %vm223_vm7 = vcmp.lt.s32.totalorder %v222_v47, 3 }
   0xa   :  { %120 = vmatpush.msra.mxu2 %v103_v12  ;;  %v36_v15 = vperm.slane %v31_v14, 0  ;;  %v99_v21 = vld [vmem:[%s423_s3] sm:$0xff]  ;;  %v69_v24 = vperm.slane %v31_v14, 1  ;;  %v161_v31 = vld [vmem:[%s425_s5 + $0x8] sm:$0x3]  ;;  %v104_v32 = vperm.slane %v31_v14, 2 }
   0xb   :  { %91 = vmatpush.msra.mxu1 %v64_v9  ;;  %v134_v22 = vld [vmem:[%s424_s4 + $0x20] sm:$0xff]  ;;  %256 = vmatpush.msk.msrb.mxu0 %vm74_vm0, %v161_v31  ;;  %v135_v38 = vperm.slane %v31_v14, 3  ;;  %v162_v42 = vperm.slane %v31_v14, 4  ;;  %v192_v48 = vperm.slane %v31_v14, 5 }
   0xc   :  { %121 = vmatpush.msra.mxu2 %v102_v13  ;;  %150 = vmatpush.msra.mxu3 %v134_v22  ;;  %v130_v30 = vld [vmem:[%s424_s4] sm:$0xff]  ;;  %s291_s4 = smov [#allocation2]  }
   0xd   :  { %92 = vmatpush.msra.mxu1 %v63_v10  ;;  %v160_v36 = vld [vmem:[%s425_s5] sm:$0xff]  ;;  %s240_s5 = sshll.u32 %s291_s4, 4  ;;  %s241_s5 = int_to_ptr.vmem [resolvable:$true] %s240_s5 }
   0xe   :  { %122 = vmatpush.msra.mxu2 %v101_v19  ;;  %151 = vmatpush.msra.mxu3 %v133_v23  ;;  %v191_v37 = vld [vmem:[%s426_s6] sm:$0x1f] }
   0xf   :  { %93 = vmatpush.msra.mxu1 %v62_v11  ;;  %185 = vmatpush.msrb.mxu0 %v160_v36 }
  0x10   :  { %123 = vmatpush.msra.mxu2 %v100_v20  ;;  %152 = vmatpush.msra.mxu3 %v132_v28 }
  0x12   :  { %124 = vmatpush.msra.mxu2 %v99_v21  ;;  %153 = vmatpush.msra.mxu3 %v131_v29 }
  0x14   :  { %154 = vmatpush.msra.mxu3 %v130_v30  ;;  %258 = vmatpush.msk.msrb.mxu2 %vm197_vm4, %v191_v37 }
  0x86   :  { %v58_v16 = vpop.f32.mrf.mxu0 }
  0x87   :  { %v59_v17 = vadd.f32 %v58_v16, %v36_v15 }
  0x89   :  { %v61_v18 = vmax.f32 %v59_v17, 0.0 }
  0x8b   :  { %253 = vmatmul.msk.f32.vlgmr.msra.gmra.mxu1 %vm70_vm2, %v61_v18 }
 0x108   :  { %v95_v25 = vpop.f32.mrf.mxu1 }
 0x109   :  { %v96_v26 = vadd.f32 %v95_v25, %v69_v24 }
 0x10b   :  { %v98_v27 = vmax.f32 %v96_v26, 0.0 }
 0x10d   :  { %254 = vmatmul.msk.f32.vlgmr.msra.gmra.mxu2 %vm105_vm3, %v98_v27 }
 0x190   :  { %v126_v33 = vpop.f32.mrf.mxu2 }
 0x191   :  { %v127_v34 = vadd.f32 %v126_v33, %v104_v32 }
 0x193   :  { %v129_v35 = vmax.f32 %v127_v34, 0.0 }
 0x195   :  { %255 = vmatmul.msk.f32.vlgmr.msra.gmra.mxu3 %vm105_vm3, %v129_v35 }
 0x218   :  { %v156_v39 = vpop.f32.mrf.mxu3 }
 0x219   :  { %v157_v40 = vadd.f32 %v156_v39, %v135_v38 }
 0x21b   :  { %v159_v41 = vmax.f32 %v157_v40, 0.0 }
 0x21d   :  { %257 = vmatmul.msk.f32.vlgmr.msrb.gmra.mxu0 %vm163_vm5, %v159_v41 }
 0x29a   :  { %v187_v43 = vpop.f32.mrf.mxu0 }
 0x29b   :  { %v188_v44 = vadd.f32 %v187_v43, %v162_v42 }
 0x29d   :  { %v190_v45 = vmax.f32 %v188_v44, 0.0 }
 0x29f   :  { %259 = vmatmul.msk.f32.vlgmr.msrb.gmra.mxu2 %vm193_vm6, %v190_v45 }
 0x322   :  { %v218_v49 = vpop.f32.mrf.mxu2 }
 0x323   :  { %v219_v50 = vadd.f32 %v218_v49, %v192_v48 }
 0x325   :  { %v224_v51 = vsel %vm223_vm7, %v219_v50, -1e+30 }
 0x326   :  { %225 = vmax.xlane.f32.xlu0 %v224_v51 }
 0x399   :  { %v226_v52 = vpop.xlane.xlu0 %225 }
 0x39a   :  { %v227_v53 = vsub.f32 %v224_v51, %v226_v52 }
 0x39c   :  { %v228_v54 = vmul.f32 1.442695, %v227_v53 }
 0x39e   :  { %261 = vpow2.f32 %v228_v54 }
 0x3a4   :  { %v262_v55 = vpop.eup %261 }
 0x3a5   :  { %230 = vadd.xlane.f32.xlu0 %v262_v55 }
 0x418   :  { %v231_v56 = vpop.xlane.xlu0 %230 }
 0x419   :  { %263 = vrcp.f32 %v231_v56 }
 0x41f   :  { %v264_v57 = vpop.eup %263 }
 0x420   :  { %v233_v58 = vmul.f32 %v264_v57, %v262_v55 }
 0x422   :  { %234 = vst [vmem:[#allocation2] sm:$0xff] %v233_v58 }
 0x423   :  { %245 = dma.vmem_to_hbm [thread:$0]  %s241_s5, 128, %s243_s29, [#allocation3]  }
 0x424   :  { %289 = dma.done.wait [#allocation3], 128  }
 0x425   :  { %290 = vsyncadd [#allocation3], 4294967168 }
 0x426   :  { %250 = vsyncpa [#allocation3], 1 }

</bundles_post_ra>
